<compile_context>
chip_gen: v7x
topology: tpu7x:2x2x1
jax: 0.10.0
libtpu: 0.0.40
codegen_flags: <defaults>
</compile_context>

<pallas_src>
import jax
import jax.numpy as jnp
from jax.experimental import pallas as pl
from jax.experimental.pallas import tpu as pltpu


def dense_tanh_kernel(x_ref, w_ref, b_ref, o_ref):
    # y = tanh(x @ W + b): MXU matmul with f32 accumulation, tanh on the EUP.
    y = jnp.dot(x_ref[...], w_ref[...], preferred_element_type=jnp.float32)
    y = y + b_ref[...].astype(jnp.float32)            # (TM, TN) + (1, TN)
    o_ref[...] = jnp.tanh(y).astype(o_ref.dtype)


def _vmem_budget_bytes():
    """Per-core VMEM capacity and a ~75% working budget (generation-aware)."""
    try:
        cap = int(pltpu.get_tpu_info().vmem_capacity_bytes)
    except Exception:  # info unavailable -> conservative (valid on v7x too)
        cap = 64 * 1024 * 1024
    return cap, int(cap * 3 // 4)


def _choose_tiles(rows, H, x_bytes, w_bytes, budget, sublane):
    """Pick (TM, TN, weight_resident) under the VMEM budget."""
    resident_w = H * H * w_bytes                        # single-buffered weight
    min_row_io = 4 * sublane * H * x_bytes              # smallest x+out double buffer
    if resident_w + min_row_io <= budget:
        # Common case: weight fully resident, only rows are tiled.
        tn = H
        weight_resident = True
        per_row = 4 * H * x_bytes                       # x tile + out tile, x2 buffers
        tm = (budget - resident_w) // per_row
    else:
        # Large H: tile output columns too; weight tile (H, TN) is double-buffered.
        weight_resident = False
        tn_max = (budget // 2) // max(1, 2 * H * w_bytes)
        tn = max(256, (tn_max // 256) * 256)            # multiple of 256 (2x256 MXU)
        if tn >= H:
            tn = H
        per_row = (2 * H + 2 * tn) * x_bytes
        tm = max(0, budget - 2 * H * tn * w_bytes) // per_row
    tm = int(max(sublane, (tm // sublane) * sublane))
    tm = min(tm, 1024)                                  # diminishing returns past ~1024 rows
    # Guarantee >= 2 row steps when rows allow: v7x second core + DMA prefetch.
    if rows >= 2 * sublane:
        half = (-(-((rows + 1) // 2) // sublane)) * sublane
        tm = min(tm, half)
    if rows < sublane:
        tm = rows                                       # block == full dim (valid layout)
    else:
        tm = min(tm, max(sublane, (rows // sublane) * sublane))
    return tm, int(tn), weight_resident


def mean_pooler(hidden_states, weight_t, bias, *, tm=None):
    """tanh(hidden_states @ weight_t + bias).

    hidden_states: (..., H); weight_t: (H, H) = torch nn.Linear weight.T; bias: (H,).
    """
    orig_shape = hidden_states.shape
    H = orig_shape[-1]
    x2d = hidden_states.reshape(-1, H)
    rows = x2d.shape[0]
    dtype = hidden_states.dtype
    x_bytes = jnp.dtype(dtype).itemsize
    w_bytes = jnp.dtype(weight_t.dtype).itemsize
    sublane = max(8, 32 // x_bytes)                     # 8 f32 / 16 bf16 / 32 int8

    vmem_cap, budget = _vmem_budget_bytes()
    TM, TN, weight_resident = _choose_tiles(rows, H, x_bytes, w_bytes, budget, sublane)
    if tm is not None:
        TM = tm
    b2d = bias.reshape(1, H)

    grid = (pl.cdiv(rows, TM), pl.cdiv(H, TN))

    def _call(single_buffer_weight):
        # Constant-index weight/bias are never re-fetched; single-buffer them to
        # reclaim the wasted second pipeline buffer (bigger TM, fits v7x 64 MiB).
        single = single_buffer_weight and weight_resident
        resident_kwargs = dict(pipeline_mode=pl.Buffered(1)) if single else {}
        n_wbuf = 1 if single else 2
        needed = (n_wbuf * (H * TN + TN) * w_bytes
                  + 2 * TM * H * x_bytes + 2 * TM * TN * x_bytes)
        vmem_limit = int(min(max(needed + (2 << 20), 16 << 20), int(vmem_cap * 0.9)))
        return pl.pallas_call(
            dense_tanh_kernel,
            out_shape=jax.ShapeDtypeStruct((rows, H), dtype),
            grid_spec=pl.GridSpec(
                grid=grid,
                in_specs=[
                    pl.BlockSpec((TM, H), lambda i, j: (i, 0)),   # row tile, revisited over j
                    pl.BlockSpec((H, TN), lambda i, j: (0, j), **resident_kwargs),
                    pl.BlockSpec((1, TN), lambda i, j: (0, j), **resident_kwargs),
                ],
                out_specs=pl.BlockSpec((TM, TN), lambda i, j: (i, j)),
            ),
            compiler_params=pltpu.CompilerParams(
                dimension_semantics=("parallel", "arbitrary"),
                vmem_limit_bytes=vmem_limit,
            ),
        )(x2d, weight_t, b2d)

    try:
        out2d = _call(single_buffer_weight=True)
    except Exception:
        # pipeline_mode=pl.Buffered(1) not accepted on this jax build: fall back
        # to default double-buffering (identical results, slightly more VMEM).
        out2d = _call(single_buffer_weight=False)

    return out2d.reshape(orig_shape)


if __name__ == "__main__":
    # Small shapes: batch=2, seq=8, hidden=32 (config.hidden_size = 32)
    B, S, H = 2, 8, 32
    key = jax.random.PRNGKey(0)
    k_x, k_w, k_b = jax.random.split(key, 3)

    hidden_states = jax.random.normal(k_x, (B, S, H), dtype=jnp.float32)
    # Deterministic synthetic parameters (not a checkpoint load).
    weight = jax.random.normal(k_w, (H, H), dtype=jnp.float32) * (1.0 / jnp.sqrt(H))
    bias = jax.random.normal(k_b, (H,), dtype=jnp.float32) * 0.01

    # Kernel expects weight transposed relative to torch.nn.Linear.weight.
    out = mean_pooler(hidden_states, weight.T, bias)
    out = jax.block_until_ready(out)

    # Reference check (plain JAX): tanh(Linear(x)), per token — no seq mean in the spec.
    ref = jnp.tanh(hidden_states @ weight.T + bias)
    assert out.shape == hidden_states.shape
    assert jnp.allclose(out, ref, atol=1e-5, rtol=1e-5)

    print("KERNEL_OK")
</pallas_src>

<mosaic_0001>
module attributes {stable_mosaic.version = 11 : i64} {
  func.func @dense_tanh_kernel(%arg0: i32, %arg1: i32, %arg2: memref<8x32xf32, #tpu.memory_space<vmem>>, %arg3: memref<32x32xf32, #tpu.memory_space<vmem>>, %arg4: memref<1x32xf32, #tpu.memory_space<vmem>>, %arg5: memref<8x32xf32, #tpu.memory_space<vmem>>) attributes {dimension_semantics = [#tpu.dimension_semantics<parallel>, #tpu.dimension_semantics<arbitrary>], iteration_bounds = array<i64: 2, 1>, scalar_prefetch = 0 : i64, scratch_operands = 0 : i64, tpu.core_type = #tpu.core_type<tc>, window_params = [{transform_indices = @transform_0, window_bounds = array<i64: 8, 32>}, {pipeline_mode = #tpu.pipeline_mode<synchronous>, transform_indices = @transform_1, window_bounds = array<i64: 32, 32>}, {pipeline_mode = #tpu.pipeline_mode<synchronous>, transform_indices = @transform_2, window_bounds = array<i64: 1, 32>}, {transform_indices = @transform_3, window_bounds = array<i64: 8, 32>}]} {
    %c0 = arith.constant 0 : index
    %c0_0 = arith.constant 0 : index
    %0 = vector.load %arg2[%c0, %c0_0] : memref<8x32xf32, #tpu.memory_space<vmem>>, vector<8x32xf32>
    %c0_1 = arith.constant 0 : index
    %c0_2 = arith.constant 0 : index
    %1 = vector.load %arg3[%c0_1, %c0_2] : memref<32x32xf32, #tpu.memory_space<vmem>>, vector<32x32xf32>
    %cst = arith.constant dense<0.000000e+00> : vector<8x32xf32>
    %2 = tpu.matmul %0, %1, %cst {dimension_numbers = #tpu.dot_dimension_numbers<[1], [0], [0], [1], [0, 0, 1, 1], [], []>} : vector<8x32xf32>, vector<32x32xf32>, vector<8x32xf32> -> vector<8x32xf32>
    %c0_3 = arith.constant 0 : index
    %c0_4 = arith.constant 0 : index
    %3 = vector.load %arg4[%c0_3, %c0_4] : memref<1x32xf32, #tpu.memory_space<vmem>>, vector<1x32xf32>
    %4 = vector.broadcast %3 : vector<1x32xf32> to vector<8x32xf32>
    %5 = arith.addf %2, %4 : vector<8x32xf32>
    %6 = math.tanh %5 : vector<8x32xf32>
    %c0_5 = arith.constant 0 : index
    %c0_6 = arith.constant 0 : index
    %7 = vector.load %arg5[%c0_5, %c0_6] : memref<8x32xf32, #tpu.memory_space<vmem>>, vector<8x32xf32>
    tpu.vector_store %arg5[%c0_5, %c0_6], %6 {strides = array<i32>} : memref<8x32xf32, #tpu.memory_space<vmem>>, vector<8x32xf32>,
    return
  }
  func.func @transform_0(%arg0: i32, %arg1: i32) -> (i32, i32) {
    %c0_i32 = arith.constant 0 : i32
    %c0_i32_0 = arith.constant 0 : i32
    return %arg0, %c0_i32 : i32, i32
  }
  func.func @transform_1(%arg0: i32, %arg1: i32) -> (i32, i32) {
    %c0_i32 = arith.constant 0 : i32
    %c0_i32_0 = arith.constant 0 : i32
    return %c0_i32, %arg1 : i32, i32
  }
  func.func @transform_2(%arg0: i32, %arg1: i32) -> (i32, i32) {
    %c0_i32 = arith.constant 0 : i32
    %c0_i32_0 = arith.constant 0 : i32
    return %c0_i32, %arg1 : i32, i32
  }
  func.func @transform_3(%arg0: i32, %arg1: i32) -> (i32, i32) {
    %c0_i32 = arith.constant 0 : i32
    return %arg0, %arg1 : i32, i32
  }
}

module attributes {stable_mosaic.version = 11 : i64} {
  func.func @dense_tanh_kernel(%arg0: i32, %arg1: i32, %arg2: memref<8x32xf32, #tpu.memory_space<vmem>>, %arg3: memref<32x32xf32, #tpu.memory_space<vmem>>, %arg4: memref<1x32xf32, #tpu.memory_space<vmem>>, %arg5: memref<8x32xf32, #tpu.memory_space<vmem>>) attributes {dimension_semantics = [#tpu.dimension_semantics<parallel>, #tpu.dimension_semantics<arbitrary>], iteration_bounds = array<i64: 2, 1>, scalar_prefetch = 0 : i64, scratch_operands = 0 : i64, tpu.core_type = #tpu.core_type<tc>, window_params = [{transform_indices = @transform_0, window_bounds = array<i64: 8, 32>}, {transform_indices = @transform_1, window_bounds = array<i64: 32, 32>}, {transform_indices = @transform_2, window_bounds = array<i64: 1, 32>}, {transform_indices = @transform_3, window_bounds = array<i64: 8, 32>}]} {
    %c0 = arith.constant 0 : index
    %c0_0 = arith.constant 0 : index
    %0 = vector.load %arg2[%c0, %c0_0] : memref<8x32xf32, #tpu.memory_space<vmem>>, vector<8x32xf32>
    %c0_1 = arith.constant 0 : index
    %c0_2 = arith.constant 0 : index
    %1 = vector.load %arg3[%c0_1, %c0_2] : memref<32x32xf32, #tpu.memory_space<vmem>>, vector<32x32xf32>
    %cst = arith.constant dense<0.000000e+00> : vector<8x32xf32>
    %2 = tpu.matmul %0, %1, %cst {dimension_numbers = #tpu.dot_dimension_numbers<[1], [0], [0], [1], [0, 0, 1, 1], [], []>} : vector<8x32xf32>, vector<32x32xf32>, vector<8x32xf32> -> vector<8x32xf32>
    %c0_3 = arith.constant 0 : index
    %c0_4 = arith.constant 0 : index
    %3 = vector.load %arg4[%c0_3, %c0_4] : memref<1x32xf32, #tpu.memory_space<vmem>>, vector<1x32xf32>
    %4 = vector.broadcast %3 : vector<1x32xf32> to vector<8x32xf32>
    %5 = arith.addf %2, %4 : vector<8x32xf32>
    %6 = math.tanh %5 : vector<8x32xf32>
    %c0_5 = arith.constant 0 : index
    %c0_6 = arith.constant 0 : index
    %7 = vector.load %arg5[%c0_5, %c0_6] : memref<8x32xf32, #tpu.memory_space<vmem>>, vector<8x32xf32>
    tpu.vector_store %arg5[%c0_5, %c0_6], %6 {strides = array<i32>} : memref<8x32xf32, #tpu.memory_space<vmem>>, vector<8x32xf32>,
    return
  }
  func.func @transform_0(%arg0: i32, %arg1: i32) -> (i32, i32) {
    %c0_i32 = arith.constant 0 : i32
    %c0_i32_0 = arith.constant 0 : i32
    return %arg0, %c0_i32 : i32, i32
  }
  func.func @transform_1(%arg0: i32, %arg1: i32) -> (i32, i32) {
    %c0_i32 = arith.constant 0 : i32
    %c0_i32_0 = arith.constant 0 : i32
    return %c0_i32, %arg1 : i32, i32
  }
  func.func @transform_2(%arg0: i32, %arg1: i32) -> (i32, i32) {
    %c0_i32 = arith.constant 0 : i32
    %c0_i32_0 = arith.constant 0 : i32
    return %c0_i32, %arg1 : i32, i32
  }
  func.func @transform_3(%arg0: i32, %arg1: i32) -> (i32, i32) {
    %c0_i32 = arith.constant 0 : i32
    return %arg0, %arg1 : i32, i32
  }
}

</mosaic_0001>

<bundles_post_ra>
// kernel: tpu_custom_call.1
= control target key start
LH: loop header
LB: loop body
LE: loop exit
PB: predicated region body
PF: predicated region fallthrough
CT: control target
= control target key end

     0   :  { %8 = vsyncpa [#allocation3], 0  ;;  %s957_s0 = inlined_call_operand.hbm [shape: f32[16,32], index: 0, kind: input, shape index: {}]   ;;  %s958_s1 = inlined_call_operand.hbm [shape: f32[32,32], index: 1, kind: input, shape index: {}]   ;;  %s959_s2 = inlined_call_operand.vmem [shape: f32[1,32], index: 2, kind: input, shape index: {}]   ;;  %s960_s3 = inlined_call_operand.hbm [shape: f32[16,32], index: 3, kind: output, shape index: {}]  }
   0x1   :  { %10 = vsyncpa [#allocation3 + $0x1], 0 }
   0x2   :  { %11 = vsyncpa [#allocation6], 0 }
   0x3   :  { %12 = vsyncpa [#allocation4], 0 }
   0x4   :  { %14 = vsyncpa [#allocation4 + $0x1], 0  ;;  %s736_s12 = smov 0   ;;  %s738_s13 = smov 0  }
   0x5   :  { %s740_s14 = smov 0   ;;  %s742_s15 = smov 0  }
   0x6   :  { %s744_s16 = smov 0   ;;  %s746_s17 = smov 0  }
   0x7 LB: > { %s442_s18 = sadd.s32 4294967295, %s706_s17   ;;  %s443_s19 = sadd.s32 4294967294, %s706_s17   ;;  %s706_s17 = sphi %s746_s17, %s20_s17   ;;  %s702_s16 = sphi %s744_s16, %s984_s16   ;;  %s698_s15 = sphi %s742_s15, %s983_s15   ;;  %s694_s14 = sphi %s740_s14, %s982_s14   ;;  %s690_s13 = sphi %s738_s13, %s981_s13   ;;  %s686_s12 = sphi %s736_s12, %s980_s12  }
   0x8   : > { %p52_p0 = scmp.ne.s32.totalorder %s690_s13, %s686_s12  ;;  %p770_p1 = scmp.eq.s32.totalorder %s442_s18, 0 }
   0x9   : > { %p774_p2 = scmp.eq.s32.totalorder %s442_s18, 1  ;;  %p136_p3 = scmp.eq.s32.totalorder %s443_s19, 1 }
   0xa   : > { %s965_s20 = scalar_select %p770_p1, 1, 0 }
   0xb   : > { %s966_s21 = scalar_select %p774_p2, 1, 0 }
   0xc   : > { %p780_p4 = por %p770_p1, %p52_p0  ;;  %p444_p5 = scmp.ge.s32.totalorder %s706_s17, 1 }
   0xd   : > { %p785_p6 = por %p136_p3, %p52_p0  ;;  %p143_p7 = scmp.lt.s32.totalorder %s706_s17, 3 }
   0xe   : > { %s967_s22 = scalar_select %p780_p4, 1, 0 }
   0xf   : > { %s968_s23 = scalar_select %p785_p6, 1, 0 }
  0x10   : > { %p790_p8 = pnand %p444_p5, %p143_p7  ;;  %s708_s25 = smov [#allocation5]  }
  0x11   : > { %s157_s26 = sshll.u32 %s708_s25, 4  ;;  %s32_s28 = sadd.s32 1, %s702_s16  ;;  %s158_s26 = int_to_ptr.vmem [resolvable:$true] %s157_s26 }
  0x12   : > { %s969_s24 = scalar_select %p790_p8, 1, 0 }
  0x13   : > { %p490_p9 = pneg %p790_p8  ;;  %s562_s4 = scalar_lea.hbm %s958_s1, 512 }
  0x14   : > { %p563_p12 = scmp.ne.s32.totalorder %s958_s1, %s562_s4  ;;  %p569_p5 = scmp.lt.u32.totalorder %s562_s4, %s958_s1 }
  0x15   : > { %p799_p11 = pnand %p490_p9, %p770_p1 }
  0x17   : > { %p564_p13 = pneg %p799_p11 }
  0x19   : > { %p565_p0 = pnand %p564_p13, %p563_p12 }
  0x1b   : > { %p566_p3 = pneg %p565_p0 }
  0x1d   : > { %p571_p7 = pnand %p569_p5, %p566_p3 }
  0x1f   : > { %574 = shalt.err (!%p571_p7)
}
  0x20   : > { %s575_s9 = scalar_lea.vmem %s158_s26, 512  ;;  %p583_p1 = scmp.lt.s32.totalorder %s158_s26, %s158_s26 }
  0x21   : > { %p576_p9 = scmp.ne.s32.totalorder %s158_s26, %s575_s9  ;;  %p584_p4 = scmp.lt.s32.totalorder %s575_s9, %s575_s9 }
  0x23   : > { %p578_p10 = pnand %p576_p9, %p564_p13  ;;  %p585_p8 = por %p584_p4, %p583_p1 }
  0x25   : > { %p579_p6 = pneg %p578_p10 }
  0x27   : > { %p586_p2 = pnand %p585_p8, %p579_p6 }
  0x29   : > { %589 = shalt.err (!%p586_p2)
}
  0x2a   : > { %s709_s10 = smov 128   ;;  %s710_s11 = smov 8  }
  0x2b   : > { %493 = dma.hbm_to_vmem [thread:$0]  (!%p799_p11), %s958_s1, 512, %s158_s26, [#allocation6], %s709_s10, %s709_s10, %s710_s11  }
  0x2c   : > { %p34_p1 = scmp.ge.s32.totalorder %s32_s28, 2  ;;  %s39_s25 = sadd.s32 1, %s694_s14 }
  0x2d   : > { %p46_p2 = scmp.ne.s32.totalorder %s694_s14, %s690_s13  ;;  %p47_p4 = scmp.eq.s32.totalorder %s706_s17, 0 }
  0x2e   : > { %s986_s28 = smov (%p34_p1, %s32_s28), 0  ;;  %p972_p8 = scmp.ne.s32.totalorder %s966_s21, 0 }
  0x2f   : > { %p826_p6 = por %p47_p4, %p46_p2  ;;  %s36_s27 = ssub.s32 %s702_s16, %s986_s28 }
  0x30   : > { %p832_p10 = por %p972_p8, %p46_p2  ;;  %p503_p12 = scmp.lt.s32.totalorder %s706_s17, 2 }
  0x31   : > { %p37_p11 = scmp.eq.s32.totalorder %s36_s27, 0  ;;  %s177_s26 = sand.u32 1, %s694_s14  }
  0x32   : > { %s448_s4 = sshll.u32 %s177_s26, 3  ;;  %s449_s6 = sshll.u32 %s702_s16, 7 }
  0x33   : > { %s841_s5 = scalar_select %p37_p11, %s694_s14, %s39_s25  }
  0x34   : > { %s847_s9 = scalar_lea.hbm %s957_s0, %s449_s6  ;;  %s181_s21 = scalar_lea.vmem [#allocation2], %s448_s4 }
  0x35   : > { %s188_s10 = sshll.u32 %s181_s21, 4  ;;  %p853_p13 = pnand %p503_p12, %p826_p6  ;;  %s849_s10 = int_to_ptr.vmem [resolvable:$true] %s188_s10 }
  0x36   : > { %s178_s18 = scalar_lea.sflag [#allocation3], %s177_s26  ;;  %s590_s19 = scalar_lea.hbm %s847_s9, 128 }
  0x37   : > { %p591_p0 = scmp.ne.s32.totalorder %s847_s9, %s590_s19  ;;  %p592_p3 = pneg %p853_p13 }
  0x38   : > { %s595_s4 = scalar_lea.hbm %s957_s0, 256  ;;  %p596_p9 = scmp.lt.u32.totalorder %s847_s9, %s957_s0 }
  0x39   : > { %p593_p5 = pnand %p592_p3, %p591_p0  ;;  %p597_p1 = scmp.lt.u32.totalorder %s595_s4, %s590_s19 }
  0x3a   : > { %p599_p4 = scmp.lt.u32.totalorder %s590_s19, %s847_s9 }
  0x3b   : > { %p594_p7 = pneg %p593_p5  ;;  %p598_p2 = por %p597_p1, %p596_p9 }
  0x3d   : > { %p600_p6 = por %p599_p4, %p598_p2 }
  0x3f   : > { %p601_p8 = pnand %p600_p6, %p594_p7 }
  0x41   : > { %604 = shalt.err (!%p601_p8)
}
  0x42   : > { %s605_s26 = scalar_lea.vmem %s849_s10, 128  ;;  %s711_s7 = smov [#allocation2]  }
  0x43   : > { %p606_p12 = scmp.ne.s32.totalorder %s849_s10, %s605_s26  ;;  %s610_s8 = sshll.u32 %s711_s7, 4  ;;  %s611_s8 = int_to_ptr.vmem [resolvable:$false] %s610_s8 }
  0x44   : > { %s612_s21 = scalar_lea.vmem %s611_s8, 256  ;;  %p613_p5 = scmp.lt.s32.totalorder %s849_s10, %s611_s8 }
  0x45   : > { %p608_p11 = pnand %p606_p12, %p592_p3  ;;  %p614_p9 = scmp.lt.s32.totalorder %s612_s21, %s605_s26 }
  0x47   : > { %p609_p0 = pneg %p608_p11  ;;  %p615_p1 = por %p614_p9, %p613_p5 }
  0x49   : > { %p616_p2 = pnand %p615_p1, %p609_p0 }
  0x4b   : > { %619 = shalt.err (!%p616_p2)
}
  0x4c   : > { %497 = dma.hbm_to_vmem [thread:$0]  (!%p853_p13), %s847_s9, 128, %s849_s10, %s178_s18  }
  0x4d   : > { %p975_p7 = scmp.ne.s32.totalorder %s969_s24, 0 }
  0x4e   : > { %s885_s19 = sand.u32 (!%p975_p7), 1, %s690_s13   ;;  %p976_p3 = scmp.ne.s32.totalorder (!%p975_p7), %s967_s22, 0 }
  0x4f   : > { %197 = sbr.rel (%p975_p7) target bundleno = 340 (0x154), region = 32  ;;  %s451_s25 = sshll.u32 (!%p975_p7), %s885_s19, 3 }
  0x50   : > { %s200_s27 = scalar_lea.sflag (!%p975_p7), [#allocation3], %s885_s19  ;;  %s203_s4 = scalar_lea.vmem (!%p975_p7), [#allocation2], %s451_s25 }
  0x56   : > { %673 = dma.done.wait (%p976_p3), %s200_s27, 128  }
  0x57   : > { %675 = vsyncadd (%p976_p3), %s200_s27, 4294967168  ;;  %p977_p13 = scmp.ne.s32.totalorder %s965_s20, 0 }
  0x59   : > { %677 = dma.done.wait (%p977_p13), [#allocation6], 512  }
  0x5a   : > { %679 = vsyncadd (%p977_p13), [#allocation6], 4294966784  ;;  %v712_v0 = vmov 0.0|0.0   ;;  %vm713_vm0 = vmmov 0   ;;  %v714_v1 = vmov 0.0   ;;  %v237_v2 = vld [vmem:[#allocation5] sm:$0xff] }
  0x5b   : > { %476 = vmatprep.subr.bf16.mxu0 %v712_v0  ;;  %473 = vmatprep.mubr.msk.f32.mxu0 %vm713_vm0, %v714_v1  ;;  %v238_v3 = vld [vmem:[#allocation5 + $0x8] sm:$0xff]  ;;  %v239_v4 = vld [vmem:[#allocation5 + $0x10] sm:$0xff]  ;;  %v240_v6 = vld [vmem:[#allocation5 + $0x18] sm:$0xff]  ;;  %vm248_vm1 = vcmask 261120   ;;  %s457_s24 = sshll.u32 %s698_s15, 7  ;;  %s232_s9 = scalar_lea.vmem [#allocation7], %s451_s25 }
  0x5c   : > { %v477_v5 = vpack.c.bf16 %v238_v3, %v237_v2  ;;  %v480_v7 = vpack.c.bf16 %v240_v6, %v239_v4  ;;  %v236_v8 = vld [vmem:[%s203_s4] sm:$0xff]  ;;  %s339_s10 = sshll.u32 %s232_s9, 4  ;;  %s908_s29 = scalar_lea.hbm %s960_s3, %s457_s24  ;;  %s910_s10 = int_to_ptr.vmem [resolvable:$true] %s339_s10 }
  0x5d   : > { %v454_v9 = vld [vmem:[%s959_s2] ss:$0 sm:$0xff]  ;;  %s325_s6 = scalar_lea.sflag [#allocation4], %s885_s19  ;;  %s620_s26 = scalar_lea.vmem %s910_s10, 128 }
  0x5e   : > { %478 = vmatpush3.bf16.msra.mxu0 %v477_v5  ;;  %p621_p4 = scmp.ne.s32.totalorder %s910_s10, %s620_s26  ;;  %s715_s15 = smov [#allocation7]  }
  0x5f   : > { %479 = vmatprep.subr.bf16.mxu0 %v712_v0  ;;  %s624_s7 = sshll.u32 %s715_s15, 4  ;;  %s625_s7 = int_to_ptr.vmem [resolvable:$false] %s624_s7 }
  0x60   : > { %p622_p6 = pnand %p621_p4, %p832_p10  ;;  %s626_s8 = scalar_lea.vmem %s625_s7, 256 }
  0x61   : > { %p627_p12 = scmp.lt.s32.totalorder %s910_s10, %s625_s7  ;;  %p628_p11 = scmp.lt.s32.totalorder %s626_s8, %s620_s26 }
  0x62   : > { %481 = vmatpush3.bf16.msra.mxu0 %v480_v7  ;;  %p623_p8 = pneg %p622_p6 }
  0x63   : > { %p629_p0 = por %p628_p11, %p627_p12 }
  0x65   : > { %474 = vmatmul.mubr.msk.f32.vlgmr.msra.gmra.mrb[0].mxu0 %vm248_vm1, %v236_v8  ;;  %p630_p5 = pnand %p629_p0, %p623_p8 }
 0x138   : > { %v318_v10 = vpop.f32.mrb[0].mxu0 }
 0x139   : > { %v319_v11 = vadd.f32 %v454_v9, %v318_v10  ;;  %v475_v12 = vpop.f32.mrb[1].mxu0 }
 0x13b   : > { %560 = vtanh.f32 %v319_v11 }
 0x145   : > { %v561_v13 = vpop.eup %560 }
 0x146   : > { %323 = vst.msk [vmem:[%s232_s9] sm:$0xff] %vm248_vm1, %v561_v13 }
 0x147   : > { %633 = shalt.err (!%p630_p5)
}
 0x148   : > { %s634_s21 = scalar_lea.hbm %s908_s29, 128  ;;  %s638_s27 = scalar_lea.hbm %s960_s3, 256 }
 0x149   : > { %p635_p9 = scmp.ne.s32.totalorder %s908_s29, %s634_s21  ;;  %p639_p7 = scmp.lt.u32.totalorder %s908_s29, %s960_s3 }
 0x14a   : > { %p640_p3 = scmp.lt.u32.totalorder %s638_s27, %s634_s21  ;;  %p642_p4 = scmp.lt.u32.totalorder %s634_s21, %s908_s29 }
 0x14b   : > { %p636_p1 = pnand %p635_p9, %p832_p10 }
 0x14c   : > { %p641_p13 = por %p640_p3, %p639_p7 }
 0x14d   : > { %p637_p2 = pneg %p636_p1 }
 0x14e   : > { %p643_p6 = por %p642_p4, %p641_p13 }
 0x150   : > { %p644_p8 = pnand %p643_p6, %p637_p2 }
 0x152   : > { %647 = shalt.err (!%p644_p8)
}
 0x153   : > { %488 = dma.vmem_to_hbm [thread:$0]  (%p832_p10), %s910_s10, 128, %s908_s29, %s325_s6  }
 0x154 PF: > { %s351_s22 = sand.u32 1, %s686_s12   ;;  %p978_p12 = scmp.ne.s32.totalorder %s968_s23, 0 }
 0x155   : > { %p979_p11 = scmp.ge.s32.totalorder %s706_s17, 2  ;;  %s352_s24 = scalar_lea.sflag [#allocation4], %s351_s22 }
 0x157   : > { %p499_p0 = pnand %p979_p11, %p978_p12 }
 0x159   : > { %681 = dma.done.wait (!%p499_p0), %s352_s24, 128  }
 0x15a   : > { %683 = vsyncadd (!%p499_p0), %s352_s24, 4294967168  ;;  %s20_s17 = sadd.s32 1, %s706_s17   ;;  %s980_s12 = smov %s690_s13 }
 0x15b   : > { %p17_p5 = scmp.ge.s32.totalorder %s20_s17, 4   ;;  %s981_s13 = smov %s694_s14 }
 0x15c   : > { %s982_s14 = smov %s841_s5  ;;  %s983_s15 = smov %s702_s16 }
 0x15d   : > { %s984_s16 = smov %s986_s28  ;;  %19 = sbr.rel (!%p17_p5) target bundleno = 7 (0x7), region = 85 }
 0x164   :  { %357 = vsyncpa [#allocation3], 1 }
 0x165   :  { %359 = vsyncpa [#allocation3 + $0x1], 1 }
 0x166   :  { %360 = vsyncpa [#allocation6], 1 }
 0x167   :  { %361 = vsyncpa [#allocation4], 1 }
 0x168   :  { %363 = vsyncpa [#allocation4 + $0x1], 1 }

// kernel: tpu_custom_call.1
= control target key start
LH: loop header
LB: loop body
LE: loop exit
PB: predicated region body
PF: predicated region fallthrough
CT: control target
= control target key end

     0   :  { %8 = vsyncpa [#allocation3], 0  ;;  %s957_s0 = inlined_call_operand.hbm [shape: f32[16,32], index: 0, kind: input, shape index: {}]   ;;  %s958_s1 = inlined_call_operand.hbm [shape: f32[32,32], index: 1, kind: input, shape index: {}]   ;;  %s959_s2 = inlined_call_operand.vmem [shape: f32[1,32], index: 2, kind: input, shape index: {}]   ;;  %s960_s3 = inlined_call_operand.hbm [shape: f32[16,32], index: 3, kind: output, shape index: {}]  }
   0x1   :  { %10 = vsyncpa [#allocation3 + $0x1], 0 }
   0x2   :  { %11 = vsyncpa [#allocation6], 0 }
   0x3   :  { %12 = vsyncpa [#allocation4], 0 }
   0x4   :  { %14 = vsyncpa [#allocation4 + $0x1], 0  ;;  %s736_s12 = smov 0   ;;  %s738_s13 = smov 0  }
   0x5   :  { %s740_s14 = smov 0   ;;  %s742_s15 = smov 0  }
   0x6   :  { %s744_s16 = smov 0   ;;  %s746_s17 = smov 0  }
   0x7 LB: > { %s442_s18 = sadd.s32 4294967295, %s706_s17   ;;  %s443_s19 = sadd.s32 4294967294, %s706_s17   ;;  %s706_s17 = sphi %s746_s17, %s20_s17   ;;  %s702_s16 = sphi %s744_s16, %s984_s16   ;;  %s698_s15 = sphi %s742_s15, %s983_s15   ;;  %s694_s14 = sphi %s740_s14, %s982_s14   ;;  %s690_s13 = sphi %s738_s13, %s981_s13   ;;  %s686_s12 = sphi %s736_s12, %s980_s12  }
   0x8   : > { %p52_p0 = scmp.ne.s32.totalorder %s690_s13, %s686_s12  ;;  %p770_p1 = scmp.eq.s32.totalorder %s442_s18, 0 }
   0x9   : > { %p774_p2 = scmp.eq.s32.totalorder %s442_s18, 1  ;;  %p136_p3 = scmp.eq.s32.totalorder %s443_s19, 1 }
   0xa   : > { %s965_s20 = scalar_select %p770_p1, 1, 0 }
   0xb   : > { %s966_s21 = scalar_select %p774_p2, 1, 0 }
   0xc   : > { %p780_p4 = por %p770_p1, %p52_p0  ;;  %p444_p5 = scmp.ge.s32.totalorder %s706_s17, 1 }
   0xd   : > { %p785_p6 = por %p136_p3, %p52_p0  ;;  %p143_p7 = scmp.lt.s32.totalorder %s706_s17, 3 }
   0xe   : > { %s967_s22 = scalar_select %p780_p4, 1, 0 }
   0xf   : > { %s968_s23 = scalar_select %p785_p6, 1, 0 }
  0x10   : > { %p790_p8 = pnand %p444_p5, %p143_p7  ;;  %s708_s25 = smov [#allocation5]  }
  0x11   : > { %s157_s26 = sshll.u32 %s708_s25, 4  ;;  %s32_s28 = sadd.s32 1, %s702_s16  ;;  %s158_s26 = int_to_ptr.vmem [resolvable:$true] %s157_s26 }
  0x12   : > { %s969_s24 = scalar_select %p790_p8, 1, 0 }
  0x13   : > { %p490_p9 = pneg %p790_p8  ;;  %s562_s4 = scalar_lea.hbm %s958_s1, 512 }
  0x14   : > { %p563_p12 = scmp.ne.s32.totalorder %s958_s1, %s562_s4  ;;  %p569_p5 = scmp.lt.u32.totalorder %s562_s4, %s958_s1 }
  0x15   : > { %p799_p11 = pnand %p490_p9, %p770_p1 }
  0x17   : > { %p564_p13 = pneg %p799_p11 }
  0x19   : > { %p565_p0 = pnand %p564_p13, %p563_p12 }
  0x1b   : > { %p566_p3 = pneg %p565_p0 }
  0x1d   : > { %p571_p7 = pnand %p569_p5, %p566_p3 }
  0x1f   : > { %574 = shalt.err (!%p571_p7)
}
  0x20   : > { %s575_s9 = scalar_lea.vmem %s158_s26, 512  ;;  %p583_p1 = scmp.lt.s32.totalorder %s158_s26, %s158_s26 }
  0x21   : > { %p576_p9 = scmp.ne.s32.totalorder %s158_s26, %s575_s9  ;;  %p584_p4 = scmp.lt.s32.totalorder %s575_s9, %s575_s9 }
  0x23   : > { %p578_p10 = pnand %p576_p9, %p564_p13  ;;  %p585_p8 = por %p584_p4, %p583_p1 }
  0x25   : > { %p579_p6 = pneg %p578_p10 }
  0x27   : > { %p586_p2 = pnand %p585_p8, %p579_p6 }
  0x29   : > { %589 = shalt.err (!%p586_p2)
}
  0x2a   : > { %s709_s10 = smov 128   ;;  %s710_s11 = smov 8  }
  0x2b   : > { %493 = dma.hbm_to_vmem [thread:$0]  (!%p799_p11), %s958_s1, 512, %s158_s26, [#allocation6], %s709_s10, %s709_s10, %s710_s11  }
  0x2c   : > { %p34_p1 = scmp.ge.s32.totalorder %s32_s28, 2  ;;  %s39_s25 = sadd.s32 1, %s694_s14 }
  0x2d   : > { %p46_p2 = scmp.ne.s32.totalorder %s694_s14, %s690_s13  ;;  %p47_p4 = scmp.eq.s32.totalorder %s706_s17, 0 }
  0x2e   : > { %s986_s28 = smov (%p34_p1, %s32_s28), 0  ;;  %p972_p8 = scmp.ne.s32.totalorder %s966_s21, 0 }
  0x2f   : > { %p826_p6 = por %p47_p4, %p46_p2  ;;  %s36_s27 = ssub.s32 %s702_s16, %s986_s28 }
  0x30   : > { %p832_p10 = por %p972_p8, %p46_p2  ;;  %p503_p12 = scmp.lt.s32.totalorder %s706_s17, 2 }
  0x31   : > { %p37_p11 = scmp.eq.s32.totalorder %s36_s27, 0  ;;  %s177_s26 = sand.u32 1, %s694_s14  }
  0x32   : > { %s448_s4 = sshll.u32 %s177_s26, 3  ;;  %s449_s6 = sshll.u32 %s702_s16, 7 }
  0x33   : > { %s841_s5 = scalar_select %p37_p11, %s694_s14, %s39_s25  }
  0x34   : > { %s847_s9 = scalar_lea.hbm %s957_s0, %s449_s6  ;;  %s181_s21 = scalar_lea.vmem [#allocation2], %s448_s4 }
  0x35   : > { %s188_s10 = sshll.u32 %s181_s21, 4  ;;  %p853_p13 = pnand %p503_p12, %p826_p6  ;;  %s849_s10 = int_to_ptr.vmem [resolvable:$true] %s188_s10 }
  0x36   : > { %s178_s18 = scalar_lea.sflag [#allocation3], %s177_s26  ;;  %s590_s19 = scalar_lea.hbm %s847_s9, 128 }
  0x37   : > { %p591_p0 = scmp.ne.s32.totalorder %s847_s9, %s590_s19  ;;  %p592_p3 = pneg %p853_p13 }
  0x38   : > { %s595_s4 = scalar_lea.hbm %s957_s0, 256  ;;  %p596_p9 = scmp.lt.u32.totalorder %s847_s9, %s957_s0 }
  0x39   : > { %p593_p5 = pnand %p592_p3, %p591_p0  ;;  %p597_p1 = scmp.lt.u32.totalorder %s595_s4, %s590_s19 }
  0x3a   : > { %p599_p4 = scmp.lt.u32.totalorder %s590_s19, %s847_s9 }
  0x3b   : > { %p594_p7 = pneg %p593_p5  ;;  %p598_p2 = por %p597_p1, %p596_p9 }
  0x3d   : > { %p600_p6 = por %p599_p4, %p598_p2 }
  0x3f   : > { %p601_p8 = pnand %p600_p6, %p594_p7 }
  0x41   : > { %604 = shalt.err (!%p601_p8)
}
  0x42   : > { %s605_s26 = scalar_lea.vmem %s849_s10, 128  ;;  %s711_s7 = smov [#allocation2]  }
  0x43   : > { %p606_p12 = scmp.ne.s32.totalorder %s849_s10, %s605_s26  ;;  %s610_s8 = sshll.u32 %s711_s7, 4  ;;  %s611_s8 = int_to_ptr.vmem [resolvable:$false] %s610_s8 }
  0x44   : > { %s612_s21 = scalar_lea.vmem %s611_s8, 256  ;;  %p613_p5 = scmp.lt.s32.totalorder %s849_s10, %s611_s8 }
  0x45   : > { %p608_p11 = pnand %p606_p12, %p592_p3  ;;  %p614_p9 = scmp.lt.s32.totalorder %s612_s21, %s605_s26 }
  0x47   : > { %p609_p0 = pneg %p608_p11  ;;  %p615_p1 = por %p614_p9, %p613_p5 }
  0x49   : > { %p616_p2 = pnand %p615_p1, %p609_p0 }
  0x4b   : > { %619 = shalt.err (!%p616_p2)
}
  0x4c   : > { %497 = dma.hbm_to_vmem [thread:$0]  (!%p853_p13), %s847_s9, 128, %s849_s10, %s178_s18  }
  0x4d   : > { %p975_p7 = scmp.ne.s32.totalorder %s969_s24, 0 }
  0x4e   : > { %s885_s19 = sand.u32 (!%p975_p7), 1, %s690_s13   ;;  %p976_p3 = scmp.ne.s32.totalorder (!%p975_p7), %s967_s22, 0 }
  0x4f   : > { %197 = sbr.rel (%p975_p7) target bundleno = 340 (0x154), region = 32  ;;  %s451_s25 = sshll.u32 (!%p975_p7), %s885_s19, 3 }
  0x50   : > { %s200_s27 = scalar_lea.sflag (!%p975_p7), [#allocation3], %s885_s19  ;;  %s203_s4 = scalar_lea.vmem (!%p975_p7), [#allocation2], %s451_s25 }
  0x56   : > { %673 = dma.done.wait (%p976_p3), %s200_s27, 128  }
  0x57   : > { %675 = vsyncadd (%p976_p3), %s200_s27, 4294967168  ;;  %p977_p13 = scmp.ne.s32.totalorder %s965_s20, 0 }
  0x59   : > { %677 = dma.done.wait (%p977_p13), [#allocation6], 512  }
  0x5a   : > { %679 = vsyncadd (%p977_p13), [#allocation6], 4294966784  ;;  %v712_v0 = vmov 0.0|0.0   ;;  %vm713_vm0 = vmmov 0   ;;  %v714_v1 = vmov 0.0   ;;  %v237_v2 = vld [vmem:[#allocation5] sm:$0xff] }
  0x5b   : > { %476 = vmatprep.subr.bf16.mxu0 %v712_v0  ;;  %473 = vmatprep.mubr.msk.f32.mxu0 %vm713_vm0, %v714_v1  ;;  %v238_v3 = vld [vmem:[#allocation5 + $0x8] sm:$0xff]  ;;  %v239_v4 = vld [vmem:[#allocation5 + $0x10] sm:$0xff]  ;;  %v240_v6 = vld [vmem:[#allocation5 + $0x18] sm:$0xff]  ;;  %vm248_vm1 = vcmask 261120   ;;  %s457_s24 = sshll.u32 %s698_s15, 7  ;;  %s232_s9 = scalar_lea.vmem [#allocation7], %s451_s25 }
  0x5c   : > { %v477_v5 = vpack.c.bf16 %v238_v3, %v237_v2  ;;  %v480_v7 = vpack.c.bf16 %v240_v6, %v239_v4  ;;  %v236_v8 = vld [vmem:[%s203_s4] sm:$0xff]  ;;  %s339_s10 = sshll.u32 %s232_s9, 4  ;;  %s908_s29 = scalar_lea.hbm %s960_s3, %s457_s24  ;;  %s910_s10 = int_to_ptr.vmem [resolvable:$true] %s339_s10 }
  0x5d   : > { %v454_v9 = vld [vmem:[%s959_s2] ss:$0 sm:$0xff]  ;;  %s325_s6 = scalar_lea.sflag [#allocation4], %s885_s19  ;;  %s620_s26 = scalar_lea.vmem %s910_s10, 128 }
  0x5e   : > { %478 = vmatpush3.bf16.msra.mxu0 %v477_v5  ;;  %p621_p4 = scmp.ne.s32.totalorder %s910_s10, %s620_s26  ;;  %s715_s15 = smov [#allocation7]  }
  0x5f   : > { %479 = vmatprep.subr.bf16.mxu0 %v712_v0  ;;  %s624_s7 = sshll.u32 %s715_s15, 4  ;;  %s625_s7 = int_to_ptr.vmem [resolvable:$false] %s624_s7 }
  0x60   : > { %p622_p6 = pnand %p621_p4, %p832_p10  ;;  %s626_s8 = scalar_lea.vmem %s625_s7, 256 }
  0x61   : > { %p627_p12 = scmp.lt.s32.totalorder %s910_s10, %s625_s7  ;;  %p628_p11 = scmp.lt.s32.totalorder %s626_s8, %s620_s26 }
  0x62   : > { %481 = vmatpush3.bf16.msra.mxu0 %v480_v7  ;;  %p623_p8 = pneg %p622_p6 }
  0x63   : > { %p629_p0 = por %p628_p11, %p627_p12 }
  0x65   : > { %474 = vmatmul.mubr.msk.f32.vlgmr.msra.gmra.mrb[0].mxu0 %vm248_vm1, %v236_v8  ;;  %p630_p5 = pnand %p629_p0, %p623_p8 }
 0x138   : > { %v318_v10 = vpop.f32.mrb[0].mxu0 }
 0x139   : > { %v319_v11 = vadd.f32 %v454_v9, %v318_v10  ;;  %v475_v12 = vpop.f32.mrb[1].mxu0 }
 0x13b   : > { %560 = vtanh.f32 %v319_v11 }
 0x145   : > { %v561_v13 = vpop.eup %560 }
 0x146   : > { %323 = vst.msk [vmem:[%s232_s9] sm:$0xff] %vm248_vm1, %v561_v13 }
 0x147   : > { %633 = shalt.err (!%p630_p5)
}
 0x148   : > { %s634_s21 = scalar_lea.hbm %s908_s29, 128  ;;  %s638_s27 = scalar_lea.hbm %s960_s3, 256 }
 0x149   : > { %p635_p9 = scmp.ne.s32.totalorder %s908_s29, %s634_s21  ;;  %p639_p7 = scmp.lt.u32.totalorder %s908_s29, %s960_s3 }
 0x14a   : > { %p640_p3 = scmp.lt.u32.totalorder %s638_s27, %s634_s21  ;;  %p642_p4 = scmp.lt.u32.totalorder %s634_s21, %s908_s29 }
 0x14b   : > { %p636_p1 = pnand %p635_p9, %p832_p10 }
 0x14c   : > { %p641_p13 = por %p640_p3, %p639_p7 }
 0x14d   : > { %p637_p2 = pneg %p636_p1 }
 0x14e   : > { %p643_p6 = por %p642_p4, %p641_p13 }
 0x150   : > { %p644_p8 = pnand %p643_p6, %p637_p2 }
 0x152   : > { %647 = shalt.err (!%p644_p8)
}
 0x153   : > { %488 = dma.vmem_to_hbm [thread:$0]  (%p832_p10), %s910_s10, 128, %s908_s29, %s325_s6  }
 0x154 PF: > { %s351_s22 = sand.u32 1, %s686_s12   ;;  %p978_p12 = scmp.ne.s32.totalorder %s968_s23, 0 }
 0x155   : > { %p979_p11 = scmp.ge.s32.totalorder %s706_s17, 2  ;;  %s352_s24 = scalar_lea.sflag [#allocation4], %s351_s22 }
 0x157   : > { %p499_p0 = pnand %p979_p11, %p978_p12 }
 0x159   : > { %681 = dma.done.wait (!%p499_p0), %s352_s24, 128  }
 0x15a   : > { %683 = vsyncadd (!%p499_p0), %s352_s24, 4294967168  ;;  %s20_s17 = sadd.s32 1, %s706_s17   ;;  %s980_s12 = smov %s690_s13 }
 0x15b   : > { %p17_p5 = scmp.ge.s32.totalorder %s20_s17, 4   ;;  %s981_s13 = smov %s694_s14 }
 0x15c   : > { %s982_s14 = smov %s841_s5  ;;  %s983_s15 = smov %s702_s16 }
 0x15d   : > { %s984_s16 = smov %s986_s28  ;;  %19 = sbr.rel (!%p17_p5) target bundleno = 7 (0x7), region = 85 }
 0x164   :  { %357 = vsyncpa [#allocation3], 1 }
 0x165   :  { %359 = vsyncpa [#allocation3 + $0x1], 1 }
 0x166   :  { %360 = vsyncpa [#allocation6], 1 }
 0x167   :  { %361 = vsyncpa [#allocation4], 1 }
 0x168   :  { %363 = vsyncpa [#allocation4 + $0x1], 1 }

</bundles_post_ra>
